<compile_context>
chip_gen: v7x
topology: tpu7x:2x2x1
jax: 0.10.0
libtpu: 0.0.40
codegen_flags: <defaults>
</compile_context>

<pallas_src>
import functools

import jax
import jax.numpy as jnp
import numpy as np
from jax.experimental import pallas as pl
from jax.experimental.pallas import tpu as pltpu


def edge_atten_kernel(alpha_src_ref, alpha_dst_ref, edges_ref, bias_ref,
                      out_ref, *, num_nodes, negative_slope):
    """Single-block kernel.

    alpha_src_ref / alpha_dst_ref : (H, N)   per-head alpha tables (nodes on lanes)
    edges_ref                     : (2, E_pad) int32 row/col indices (padded with 0)
    bias_ref                      : (1, E_pad) f32 additive mask {0, -1e30}
    out_ref                       : (H, E_pad) f32 attention probabilities
    """
    N = num_nodes
    E_pad = out_ref.shape[1]
    dot_dtype = alpha_src_ref.dtype

    row = edges_ref[0:1, :]                                    # (1, E_pad)
    col = edges_ref[1:2, :]                                    # (1, E_pad)

    # One shared iota; one-hot gathers built directly in the MXU dtype.
    n_iota = jax.lax.broadcasted_iota(jnp.int32, (N, E_pad), 0)
    g_src = (n_iota == row).astype(dot_dtype)                  # (N, E_pad)
    g_dst = (n_iota == col).astype(dot_dtype)                  # (N, E_pad)

    # logits[h, e] = alpha_src[h, row[e]] + alpha_dst[h, col[e]]
    # via two (H, N) @ (N, E_pad) matmuls accumulated in f32 (lane-dense output).
    logits = (jnp.dot(alpha_src_ref[...], g_src,
                      preferred_element_type=jnp.float32) +
              jnp.dot(alpha_dst_ref[...], g_dst,
                      preferred_element_type=jnp.float32))     # (H, E_pad)

    # LeakyReLU.
    logits = jnp.where(logits > 0, logits, negative_slope * logits)

    # Additive padding mask (must precede the max so padded columns,
    # which alias node 0's logits, can never win).
    logits = logits + bias_ref[...]

    # Softmax over the edge (lane) axis per head == F.softmax(dim=-2) on (E, H).
    m = jnp.max(logits, axis=1, keepdims=True)                 # (H, 1)
    p = jnp.exp(logits - m)                                    # (H, E_pad)
    s = jnp.sum(p, axis=1, keepdims=True)                      # (H, 1)
    inv = pl.reciprocal(s, approx=False)                       # exact f32 parity
    out_ref[...] = p * inv


def fold_edge_atten_weights(W, b, a, num_heads):
    """One-time weight-side fold of (nn.Linear ∘ per-head attention vector).

    Returns (m_src, m_dst, bb_src, bb_dst) such that
      alpha_src[h, n] = m_src[h] . x[n] + bb_src[h]   (same for dst).
    Cache the result; it only depends on the module parameters.
    """
    HC, Cin = W.shape
    H = num_heads
    C = HC // H
    Wr = W.reshape(H, C, Cin).astype(jnp.float32)
    br = b.reshape(H, C).astype(jnp.float32)
    a_src = a[:, :C].astype(jnp.float32)                       # (H, C)
    a_dst = a[:, C:].astype(jnp.float32)                       # (H, C)
    m_src = jnp.einsum('hci,hc->hi', Wr, a_src)                # (H, Cin)
    m_dst = jnp.einsum('hci,hc->hi', Wr, a_dst)                # (H, Cin)
    bb_src = jnp.einsum('hc,hc->h', br, a_src)                 # (H,)
    bb_dst = jnp.einsum('hc,hc->h', br, a_dst)                 # (H,)
    return m_src, m_dst, bb_src, bb_dst


@functools.partial(jax.jit, static_argnames=("alpha", "use_bf16_mxu"))
def _edge_atten_forward_folded(node_feats, edge_index, m_src, m_dst, bb_src,
                               bb_dst, *, alpha, use_bf16_mxu):
    N = node_feats.shape[0]
    H = m_src.shape[0]
    E = edge_index.shape[1]
    E_pad = ((E + 127) // 128) * 128                           # lane-dense edges

    # --- XLA-side prep (fused around the pallas_call by this jit) ---
    xT = node_feats.T.astype(jnp.float32)                      # (Cin, N)
    alpha_src = m_src @ xT + bb_src[:, None]                   # (H, N)
    alpha_dst = m_dst @ xT + bb_dst[:, None]                   # (H, N)

    dot_dtype = jnp.bfloat16 if use_bf16_mxu else jnp.float32
    alpha_src = alpha_src.astype(dot_dtype)
    alpha_dst = alpha_dst.astype(dot_dtype)

    edges = jnp.zeros((2, E_pad), jnp.int32).at[:, :E].set(
        edge_index.astype(jnp.int32))
    bias = jnp.where(jnp.arange(E_pad)[None, :] < E, 0.0, -1e30
                     ).astype(jnp.float32)                     # (1, E_pad)

    kernel = functools.partial(edge_atten_kernel, num_nodes=N,
                               negative_slope=alpha)

    # Small problem: everything fits in VMEM, single block, no grid.
    probs_he = pl.pallas_call(
        kernel,
        out_shape=jax.ShapeDtypeStruct((H, E_pad), jnp.float32),
        in_specs=[pl.BlockSpec(memory_space=pltpu.MemorySpace.VMEM)] * 4,
        out_specs=pl.BlockSpec(memory_space=pltpu.MemorySpace.VMEM),
        compiler_params=pltpu.CompilerParams(
            vmem_limit_bytes=32 * 1024 * 1024),
    )(alpha_src, alpha_dst, edges, bias)

    # Back to the module's (E, H) layout.
    return probs_he[:, :E].T


def edge_atten_forward(node_feats, edge_index, W, b, a, num_heads, alpha=0.2,
                       use_bf16_mxu=False):
    """node_feats: (N, Cin), edge_index: (2, E) int, W: (H*C, Cin), b: (H*C,),
    a: (H, 2*C). Returns attn_probs (E, H) matching the PyTorch module."""
    assert edge_index.shape[1] > 0, "Edge_atten requires at least one edge"
    folded = fold_edge_atten_weights(W, b, a, num_heads)
    return _edge_atten_forward_folded(node_feats, edge_index, *folded,
                                      alpha=alpha, use_bf16_mxu=use_bf16_mxu)


def edge_atten_reference(node_feats, edge_index, W, b, a, num_heads, alpha=0.2):
    """Pure-JAX reference mirroring the PyTorch forward."""
    N = node_feats.shape[0]
    HC = W.shape[0]
    H = num_heads
    C = HC // H
    hfeat = node_feats @ W.T + b                               # (N, H*C)
    hf = hfeat.reshape(N, H, C)
    src = hf[edge_index[0]]                                    # (E, H, C)
    dst = hf[edge_index[1]]                                    # (E, H, C)
    a_input = jnp.concatenate([src, dst], axis=-1)             # (E, H, 2C)
    logits = jnp.einsum('bhc,hc->bh', a_input, a)              # (E, H)
    logits = jnp.where(logits > 0, logits, alpha * logits)
    return jax.nn.softmax(logits, axis=0)


if __name__ == "__main__":
    key = jax.random.PRNGKey(0)
    k_x, k_e, k_w, k_b, k_a = jax.random.split(key, 5)

    # Small shapes implied by the module's forward:
    N = 16          # num_nodes
    Cin = 8         # in_channels
    out_channels = 8
    num_heads = 2   # concat_heads=True -> per-head C = out_channels // num_heads
    C = out_channels // num_heads
    HC = num_heads * C
    E = 32          # number of edges
    alpha = 0.2

    node_feats = jax.random.normal(k_x, (N, Cin), dtype=jnp.float32)
    edge_index = jax.random.randint(k_e, (2, E), 0, N, dtype=jnp.int32)

    # Deterministic xavier_uniform-style init (gain=1.414), as in __init__.
    gain = 1.414
    w_bound = gain * float(np.sqrt(6.0 / (Cin + HC)))
    W = jax.random.uniform(k_w, (HC, Cin), minval=-w_bound, maxval=w_bound,
                           dtype=jnp.float32)
    b_bound = 1.0 / float(np.sqrt(Cin))
    b = jax.random.uniform(k_b, (HC,), minval=-b_bound, maxval=b_bound,
                           dtype=jnp.float32)
    a_bound = gain * float(np.sqrt(6.0 / (num_heads + 2 * C)))
    a = jax.random.uniform(k_a, (num_heads, 2 * C), minval=-a_bound,
                           maxval=a_bound, dtype=jnp.float32)

    ref = jax.block_until_ready(
        edge_atten_reference(node_feats, edge_index, W, b, a, num_heads, alpha))

    # Default f32 path — exact-parity structure, tight tolerance.
    out_f32 = jax.block_until_ready(
        edge_atten_forward(node_feats, edge_index, W, b, a, num_heads, alpha,
                           use_bf16_mxu=False))
    assert out_f32.shape == (E, num_heads)
    np.testing.assert_allclose(np.asarray(out_f32), np.asarray(ref),
                               rtol=1e-5, atol=1e-5)

    # Optional bf16-MXU-input path (v6e/v7x), looser tolerance.
    out_bf16 = jax.block_until_ready(
        edge_atten_forward(node_feats, edge_index, W, b, a, num_heads, alpha,
                           use_bf16_mxu=True))
    assert out_bf16.shape == (E, num_heads)
    np.testing.assert_allclose(np.asarray(out_bf16), np.asarray(ref),
                               rtol=8e-2, atol=2e-3)

    print("KERNEL_OK")
</pallas_src>

<mosaic_0001>
module attributes {stable_mosaic.version = 11 : i64} {
  func.func @edge_atten_kernel(%arg0: memref<2x16xf32, #tpu.memory_space<vmem>>, %arg1: memref<2x16xf32, #tpu.memory_space<vmem>>, %arg2: memref<2x128xi32, #tpu.memory_space<vmem>>, %arg3: memref<1x128xf32, #tpu.memory_space<vmem>>, %arg4: memref<2x128xf32, #tpu.memory_space<vmem>>) attributes {dimension_semantics = [], scalar_prefetch = 0 : i64, scratch_operands = 0 : i64, tpu.core_type = #tpu.core_type<tc>} {
    %c0 = arith.constant 0 : index
    %c0_0 = arith.constant 0 : index
    %0 = vector.load %arg2[%c0, %c0_0] : memref<2x128xi32, #tpu.memory_space<vmem>>, vector<1x128xi32>
    %c1 = arith.constant 1 : index
    %c0_1 = arith.constant 0 : index
    %1 = vector.load %arg2[%c1, %c0_1] : memref<2x128xi32, #tpu.memory_space<vmem>>, vector<1x128xi32>
    %2 = tpu.iota {dimensions = array<i32: 0>} : vector<16x128xi32>
    %3 = vector.broadcast %0 : vector<1x128xi32> to vector<16x128xi32>
    %4 = arith.cmpi eq, %2, %3 : vector<16x128xi32>
    %5 = arith.extui %4 : vector<16x128xi1> to vector<16x128xi32>
    %6 = arith.sitofp %5 : vector<16x128xi32> to vector<16x128xf32>
    %7 = vector.broadcast %1 : vector<1x128xi32> to vector<16x128xi32>
    %8 = arith.cmpi eq, %2, %7 : vector<16x128xi32>
    %9 = arith.extui %8 : vector<16x128xi1> to vector<16x128xi32>
    %10 = arith.sitofp %9 : vector<16x128xi32> to vector<16x128xf32>
    %c0_2 = arith.constant 0 : index
    %c0_3 = arith.constant 0 : index
    %11 = vector.load %arg0[%c0_2, %c0_3] : memref<2x16xf32, #tpu.memory_space<vmem>>, vector<2x16xf32>
    %cst = arith.constant dense<0.000000e+00> : vector<2x128xf32>
    %12 = tpu.matmul %11, %6, %cst {dimension_numbers = #tpu.dot_dimension_numbers<[1], [0], [0], [1], [0, 0, 1, 1], [], []>} : vector<2x16xf32>, vector<16x128xf32>, vector<2x128xf32> -> vector<2x128xf32>
    %c0_4 = arith.constant 0 : index
    %c0_5 = arith.constant 0 : index
    %13 = vector.load %arg1[%c0_4, %c0_5] : memref<2x16xf32, #tpu.memory_space<vmem>>, vector<2x16xf32>
    %cst_6 = arith.constant dense<0.000000e+00> : vector<2x128xf32>
    %14 = tpu.matmul %13, %10, %cst_6 {dimension_numbers = #tpu.dot_dimension_numbers<[1], [0], [0], [1], [0, 0, 1, 1], [], []>} : vector<2x16xf32>, vector<16x128xf32>, vector<2x128xf32> -> vector<2x128xf32>
    %15 = arith.addf %12, %14 : vector<2x128xf32>
    %cst_7 = arith.constant 0.000000e+00 : f32
    %16 = vector.broadcast %cst_7 : f32 to vector<2x128xf32>
    %17 = arith.cmpf ogt, %15, %16 : vector<2x128xf32>
    %cst_8 = arith.constant 2.000000e-01 : f32
    %18 = vector.broadcast %cst_8 : f32 to vector<2x128xf32>
    %19 = arith.mulf %18, %15 : vector<2x128xf32>
    %20 = arith.select %17, %15, %19 : vector<2x128xi1>, vector<2x128xf32>
    %c0_9 = arith.constant 0 : index
    %c0_10 = arith.constant 0 : index
    %21 = vector.load %arg3[%c0_9, %c0_10] : memref<1x128xf32, #tpu.memory_space<vmem>>, vector<1x128xf32>
    %22 = vector.broadcast %21 : vector<1x128xf32> to vector<2x128xf32>
    %23 = arith.addf %20, %22 : vector<2x128xf32>
    %cst_11 = arith.constant dense<0xFF800000> : vector<2xf32>
    %24 = vector.multi_reduction <maximumf>, %23, %cst_11 [1] : vector<2x128xf32> to vector<2xf32>
    %25 = vector.shape_cast %24 : vector<2xf32> to vector<2x1xf32>
    %26 = vector.broadcast %25 : vector<2x1xf32> to vector<2x128xf32>
    %27 = arith.subf %23, %26 : vector<2x128xf32>
    %28 = math.exp %27 : vector<2x128xf32>
    %cst_12 = arith.constant dense<0.000000e+00> : vector<2xf32>
    %29 = vector.multi_reduction <add>, %28, %cst_12 [1] : vector<2x128xf32> to vector<2xf32>
    %30 = vector.shape_cast %29 : vector<2xf32> to vector<2x1xf32>
    %31 = tpu.reciprocal %30 : vector<2x1xf32> -> vector<2x1xf32>
    %32 = vector.broadcast %31 : vector<2x1xf32> to vector<2x128xf32>
    %33 = arith.mulf %28, %32 : vector<2x128xf32>
    %c0_13 = arith.constant 0 : index
    %c0_14 = arith.constant 0 : index
    %34 = vector.load %arg4[%c0_13, %c0_14] : memref<2x128xf32, #tpu.memory_space<vmem>>, vector<2x128xf32>
    tpu.vector_store %arg4[%c0_13, %c0_14], %33 {strides = array<i32>} : memref<2x128xf32, #tpu.memory_space<vmem>>, vector<2x128xf32>,
    return
  }
}

</mosaic_0001>

<bundles_post_ra>
// kernel: _edge_atten_forward_folded.1
= control target key start
LH: loop header
LB: loop body
LE: loop exit
PB: predicated region body
PF: predicated region fallthrough
CT: control target
= control target key end

     0   :  { %v19_v0 = vlaneseq  ;;  %v267_v1 = vmov 0.0|0.0   ;;  %vm268_vm0 = vmmov 0   ;;  %v269_v5 = vmov 0.0   ;;  %s314_s2 = inlined_call_operand.vmem [shape: s32[2,128], index: 2, kind: input, shape index: {}]   ;;  %s315_s1 = inlined_call_operand.vmem [shape: f32[2,16], index: 1, kind: input, shape index: {}]   ;;  %s316_s0 = inlined_call_operand.vmem [shape: f32[2,16], index: 0, kind: input, shape index: {}]   ;;  %s317_s3 = inlined_call_operand.vmem [shape: f32[1,128], index: 3, kind: input, shape index: {}]   ;;  %s318_s4 = inlined_call_operand.vmem [shape: f32[2,128], index: 4, kind: output, shape index: {}]  }
   0x1   :  { %252 = vmatprep.subr.bf16.mxu1 %v267_v1  ;;  %255 = vmatprep.subr.bf16.mxu0 %v267_v1  ;;  %v222_v2 = vld [vmem:[%s314_s2 + $0x1] ss:$0 sm:$0xff]  ;;  %v219_v4 = vld [vmem:[%s314_s2] ss:$0 sm:$0xff]  ;;  %v270_v7 = vmov 1.0|1.0  }
   0x2   :  { %v20_v3 = vshrl.u32 %v19_v0, 7  ;;  %242 = vmatprep.mubr.msk.f32.mxu1 %vm268_vm0, %v269_v5  ;;  %249 = vmatprep.mubr.msk.f32.mxu0 %vm268_vm0, %v269_v5  ;;  %v43_v8 = vld [vmem:[%s315_s1] sm:$0x3]  ;;  %vm44_vm7 = vcmask 130048   ;;  %vm202_vm9 = vcmask 1041408  }
   0x3   :  { %v42_v9 = vld [vmem:[%s316_s0] sm:$0x3] }
   0x4   :  { %v21_v6 = vadd.s32 8, %v20_v3  ;;  %vm36_vm1 = vcmp.eq.s32.totalorder %v20_v3, %v222_v2  ;;  %vm26_vm2 = vcmp.eq.s32.totalorder %v20_v3, %v219_v4  ;;  %v231_v16 = vld [vmem:[%s317_s3] ss:$0 sm:$0xff] }
   0x6   :  { %vm37_vm3 = vcmp.eq.s32.totalorder %v21_v6, %v222_v2  ;;  %vm27_vm4 = vcmp.eq.s32.totalorder %v21_v6, %v219_v4 }
   0x7   :  { %vm253_vm5 = vmpackc.low %vm37_vm3, %vm36_vm1 }
   0x8   :  { %254 = vmatpush3.bf16.msk.msra.mxu1 %vm253_vm5, %v270_v7  ;;  %vm256_vm6 = vmpackc.low %vm27_vm4, %vm26_vm2 }
   0x9   :  { %257 = vmatpush3.bf16.msk.msra.mxu0 %vm256_vm6, %v270_v7 }
   0xb   :  { %243 = vmatmul.mubr.msk.f32.vlgmr.msra.gmra.mrb[0].mxu1 %vm44_vm7, %v43_v8 }
   0xc   :  { %250 = vmatmul.mubr.msk.f32.vlgmr.msra.gmra.mrb[0].mxu0 %vm44_vm7, %v42_v9 }
  0xde   :  { %v114_v10 = vpop.f32.mrb[0].mxu1 }
  0xdf   :  { %v187_v11 = vpop.f32.mrb[0].mxu0  ;;  %v244_v12 = vpop.f32.mrb[1].mxu1 }
  0xe0   :  { %v188_v13 = vadd.f32 %v187_v11, %v114_v10  ;;  %v251_v14 = vpop.f32.mrb[1].mxu0 }
  0xe2   :  { %v192_v15 = vmul.f32 0.2, %v188_v13  ;;  %vm191_vm8 = vcmp.gt.f32.partialorder %v188_v13, 0.0 }
  0xe4   :  { %v193_v17 = vsel %vm191_vm8, %v188_v13, %v192_v15 }
  0xe5   :  { %v201_v18 = vadd.f32 %v231_v16, %v193_v17 }
  0xe7   :  { %v203_v19 = vsel %vm202_vm9, %v201_v18, -inf }
  0xe8   :  { %204 = vmax.xlane.f32.xlu0 %v203_v19 }
 0x175   :  { %v205_v20 = vpop.xlane.xlu0 %204 }
 0x176   :  { %v206_v21 = vsub.f32 %v201_v18, %v205_v20 }
 0x178   :  { %v207_v22 = vmul.f32 1.442695, %v206_v21 }
 0x17a   :  { %263 = vpow2.f32 %v207_v22 }
 0x184   :  { %v264_v23 = vpop.eup %263 }
 0x185   :  { %v209_v24 = vsel %vm202_vm9, %v264_v23, 0.0 }
 0x186   :  { %210 = vadd.xlane.f32.xlu0 %v209_v24 }
 0x213   :  { %v211_v25 = vpop.xlane.xlu0 %210 }
 0x214   :  { %265 = vrcp.f32 %v211_v25 }
 0x21e   :  { %v266_v26 = vpop.eup %265 }
 0x21f   :  { %v213_v27 = vmul.f32 %v266_v26, %v264_v23 }
 0x221   :  { %214 = vst [vmem:[%s318_s4] sm:$0x3] %v213_v27 }

</bundles_post_ra>
